<compile_context>
chip_gen: v7x
topology: tpu7x:2x2x1
jax: 0.10.0
libtpu: 0.0.40
codegen_flags: <defaults>
</compile_context>

<pallas_src>
import jax
import jax.numpy as jnp
from jax import lax
from jax.experimental import pallas as pl
from jax.experimental.pallas import tpu as pltpu


def _attn_kernel(pano_ref, fact_ref,
                 wq_ref, bq_ref, wk_ref, bk_ref, wv_ref, bv_ref,
                 mask_ref, out_ref):
    # pano_ref : (tb*36,     vis_dim)  f32      fact_ref : (tb*n_fact, fact_dim) f32
    # weights  : (in, out)   bf16               biases   : (1, out)   f32
    # mask_ref : (tb*36, tb*n_fact)    f32  (0 on the per-batch block diagonal, -1e9 off)
    # out_ref  : (tb*36, d_model)      f32

    # Cast activations to bf16 in VMEM (feeds the MXU's native path; no extra HBM pass).
    x_q = pano_ref[...].astype(jnp.bfloat16)
    x_kv = fact_ref[...].astype(jnp.bfloat16)

    # Flattened projections: one big MXU matmul each, f32 accumulation, f32 bias add.
    # (The softmax scale is pre-folded into wq / bq by the wrapper.)
    q = jnp.dot(x_q, wq_ref[...], preferred_element_type=jnp.float32) + bq_ref[...]
    k = jnp.dot(x_kv, wk_ref[...], preferred_element_type=jnp.float32) + bk_ref[...]
    v = jnp.dot(x_kv, wv_ref[...], preferred_element_type=jnp.float32) + bv_ref[...]

    # Attention logits for the whole batch block at once: contract the last dims of
    # q and k (== q @ k^T without materializing a transpose), bf16 operands, f32 acc.
    # Cross-batch entries are killed by the additive block-diagonal mask, so the
    # softmax and p@v below are exactly per-batch attention, but lane-dense.
    dots = lax.dot_general(
        q.astype(jnp.bfloat16), k.astype(jnp.bfloat16),
        dimension_numbers=(((1,), (1,)), ((), ())),
        preferred_element_type=jnp.float32)
    dots = dots + mask_ref[...]

    # Softmax over the fact axis (dim=2 in the PyTorch module), all in f32.
    dots = dots - jnp.max(dots, axis=-1, keepdims=True)
    p = jnp.exp(dots)
    p = p * pl.reciprocal(jnp.sum(p, axis=-1, keepdims=True), approx=True)

    # Weighted sum of values, bf16 operands / f32 accumulation, one dense aligned store.
    out_ref[...] = jnp.dot(p.astype(jnp.bfloat16), v.astype(jnp.bfloat16),
                           preferred_element_type=jnp.float32).astype(out_ref.dtype)


def _pick_tb(ba, n_fact, block_b):
    """Pick the batch block size.

    Partial blocks must keep the second-to-last block dim a multiple of 8 sublanes
    ((tb*36) % 8 == 0 and (tb*n_fact) % 8 == 0); a block covering the whole batch is
    always legal.  Prefer a tb that divides ba so no padding pass is needed.
    """
    tb = max(1, min(block_b, ba))
    if tb >= ba:
        return ba

    def ok(t):
        return (t * 36) % 8 == 0 and (t * n_fact) % 8 == 0

    for t in range(tb, 0, -1):          # prefer divisors of ba (no jnp.pad pass)
        if ok(t) and ba % t == 0:
            return t
    for t in range(tb, 0, -1):
        if ok(t):
            return t
    return ba


def scene_object_attention(pano_feats, fact_embeds, params, d_model, *, block_b=8):
    ba, n_views, vis_dim = pano_feats.shape
    ba_f, n_fact, fact_dim = fact_embeds.shape
    assert ba == ba_f
    assert n_views == 36, "module hard-codes 36 panorama views"
    scale = float(d_model) ** (-0.5)

    # Batch blocking.  tb*36 rows per q-projection matmul (>=288 for tb>=8) keeps the
    # MXU row-dense on v5e (128) and v6e/v7x (256); keep nb >= 2 if possible so the
    # "parallel" grid axis shards across v7x's two TensorCores.
    tb = _pick_tb(ba, n_fact, block_b)
    nb = -(-ba // tb)
    ba_pad = nb * tb

    pano = pano_feats
    fact = fact_embeds
    if ba_pad != ba:
        pano = jnp.pad(pano, ((0, ba_pad - ba), (0, 0), (0, 0)))
        fact = jnp.pad(fact, ((0, ba_pad - ba), (0, 0), (0, 0)))

    # Free, contiguous merges of leading dims (metadata-only reshapes outside the kernel).
    pano2 = pano.reshape(ba_pad * 36, vis_dim)
    fact2 = fact.reshape(ba_pad * n_fact, fact_dim)

    # Fold the softmax scale into the q projection (tiny one-time param op); cast
    # weights to bf16 for the MXU, keep biases f32 so post-matmul math stays f32.
    wq = (params["wq"].astype(jnp.float32) * scale).astype(jnp.bfloat16)
    bq = (params["bq"].astype(jnp.float32) * scale)
    wk = params["wk"].astype(jnp.bfloat16)
    bk = params["bk"].astype(jnp.float32)
    wv = params["wv"].astype(jnp.bfloat16)
    bv = params["bv"].astype(jnp.float32)

    # Block-diagonal additive mask (same for every grid step): row r belongs to batch
    # r//36, column c to batch c//n_fact; off-diagonal entries get -1e9 so they
    # underflow to exactly 0 after the max-subtracted exp.
    row_b = jnp.arange(tb * 36, dtype=jnp.int32) // 36
    col_b = jnp.arange(tb * n_fact, dtype=jnp.int32) // n_fact
    neg_mask = jnp.where(row_b[:, None] == col_b[None, :],
                         jnp.float32(0.0), jnp.float32(-1e9))

    def const_spec(arr):
        return pl.BlockSpec(arr.shape, lambda b: (0, 0))
    # NOTE: the constant-index weight/bias/mask blocks are double-buffered by default;
    # on v7x (64 MiB VMEM) pin them with pipeline_mode=pl.Buffered(1) if vis_dim*d_model
    # grows large enough to matter.

    # Advisory cost estimate so XLA can schedule neighboring ops around the kernel.
    flops = (2 * ba_pad * 36 * vis_dim * d_model            # q projection
             + 2 * 2 * ba_pad * n_fact * fact_dim * d_model  # k, v projections
             + 2 * 2 * ba_pad * 36 * (tb * n_fact) * d_model)  # q@k^T and p@v (block-dense)
    bytes_accessed = (pano2.size * 4 + fact2.size * 4
                      + (wq.size + wk.size + wv.size) * 2
                      + (bq.size + bk.size + bv.size) * 4
                      + neg_mask.size * 4
                      + ba_pad * 36 * d_model * 4)
    cost = pl.CostEstimate(flops=int(flops),
                           transcendentals=int(ba_pad * 36 * tb * n_fact),
                           bytes_accessed=int(bytes_accessed))

    out2 = pl.pallas_call(
        _attn_kernel,
        out_shape=jax.ShapeDtypeStruct((ba_pad * 36, d_model), jnp.float32),
        grid_spec=pltpu.PrefetchScalarGridSpec(
            num_scalar_prefetch=0,
            grid=(nb,),
            in_specs=[
                pl.BlockSpec((tb * 36, vis_dim), lambda b: (b, 0)),       # pano (flat)
                pl.BlockSpec((tb * n_fact, fact_dim), lambda b: (b, 0)),  # facts (flat)
                const_spec(wq), const_spec(bq),                           # Wq, bq
                const_spec(wk), const_spec(bk),                           # Wk, bk
                const_spec(wv), const_spec(bv),                           # Wv, bv
                const_spec(neg_mask),                                     # block mask
            ],
            out_specs=pl.BlockSpec((tb * 36, d_model), lambda b: (b, 0)),
        ),
        compiler_params=pltpu.CompilerParams(dimension_semantics=("parallel",)),
        cost_estimate=cost,
    )(pano2, fact2, wq, bq, wk, bk, wv, bv, neg_mask)

    return out2[: ba * 36].reshape(ba, 36, d_model)


def _reference(pano_feats, fact_embeds, params, d_model):
    # Pure-JAX (f32) mirror of the PyTorch forward pass for verification.
    q = pano_feats @ params["wq"] + params["bq"]
    k = fact_embeds @ params["wk"] + params["bk"]
    v = fact_embeds @ params["wv"] + params["bv"]
    dots = jnp.einsum("bqd,bkd->bqk", q, k) * (float(d_model) ** (-0.5))
    p = jax.nn.softmax(dots, axis=2)
    return jnp.einsum("bqk,bkd->bqd", p, v)


if __name__ == "__main__":
    # Small shapes consistent with the module's forward.  ba=4 with block_b=2 gives a
    # 2-step grid with partial (but sublane-legal) blocks and no batch padding.
    ba, n_fact = 4, 8
    vis_dim, fact_dim, d_model = 64, 32, 32

    key = jax.random.PRNGKey(0)
    keys = jax.random.split(key, 8)

    pano_feats = jax.random.normal(keys[0], (ba, 36, vis_dim), dtype=jnp.float32)
    fact_embeds = jax.random.normal(keys[1], (ba, n_fact, fact_dim), dtype=jnp.float32)

    # Deterministic synthetic parameters (nn.Linear(in, out) -> stored as (in, out)).
    params = {
        "wq": 0.05 * jax.random.normal(keys[2], (vis_dim, d_model), dtype=jnp.float32),
        "bq": 0.01 * jax.random.normal(keys[3], (1, d_model), dtype=jnp.float32),
        "wk": 0.05 * jax.random.normal(keys[4], (fact_dim, d_model), dtype=jnp.float32),
        "bk": 0.01 * jax.random.normal(keys[5], (1, d_model), dtype=jnp.float32),
        "wv": 0.05 * jax.random.normal(keys[6], (fact_dim, d_model), dtype=jnp.float32),
        "bv": 0.01 * jax.random.normal(keys[7], (1, d_model), dtype=jnp.float32),
    }

    out = scene_object_attention(pano_feats, fact_embeds, params, d_model, block_b=2)
    out = jax.block_until_ready(out)

    ref = _reference(pano_feats, fact_embeds, params, d_model)
    assert out.shape == (ba, 36, d_model)
    # bf16 operands feed the MXU (projections and both attention matmuls), so compare
    # against the f32 reference with a bf16-appropriate tolerance.
    assert jnp.allclose(out, ref, atol=2e-2, rtol=2e-2), "mismatch vs reference"

    print("KERNEL_OK")
</pallas_src>

<mosaic_0001>
module attributes {stable_mosaic.version = 11 : i64} {
  func.func @_attn_kernel(%arg0: i32, %arg1: memref<72x64xf32, #tpu.memory_space<vmem>>, %arg2: memref<16x32xf32, #tpu.memory_space<vmem>>, %arg3: memref<64x32xbf16, #tpu.memory_space<vmem>>, %arg4: memref<1x32xf32, #tpu.memory_space<vmem>>, %arg5: memref<32x32xbf16, #tpu.memory_space<vmem>>, %arg6: memref<1x32xf32, #tpu.memory_space<vmem>>, %arg7: memref<32x32xbf16, #tpu.memory_space<vmem>>, %arg8: memref<1x32xf32, #tpu.memory_space<vmem>>, %arg9: memref<72x16xf32, #tpu.memory_space<vmem>>, %arg10: memref<72x32xf32, #tpu.memory_space<vmem>>) attributes {dimension_semantics = [#tpu.dimension_semantics<parallel>], iteration_bounds = array<i64: 2>, scalar_prefetch = 0 : i64, scratch_operands = 0 : i64, tpu.core_type = #tpu.core_type<tc>, window_params = [{transform_indices = @transform_0, window_bounds = array<i64: 72, 64>}, {transform_indices = @transform_1, window_bounds = array<i64: 16, 32>}, {pipeline_mode = #tpu.pipeline_mode<synchronous>, transform_indices = @transform_2, window_bounds = array<i64: 64, 32>}, {pipeline_mode = #tpu.pipeline_mode<synchronous>, transform_indices = @transform_3, window_bounds = array<i64: 1, 32>}, {pipeline_mode = #tpu.pipeline_mode<synchronous>, transform_indices = @transform_4, window_bounds = array<i64: 32, 32>}, {pipeline_mode = #tpu.pipeline_mode<synchronous>, transform_indices = @transform_5, window_bounds = array<i64: 1, 32>}, {pipeline_mode = #tpu.pipeline_mode<synchronous>, transform_indices = @transform_6, window_bounds = array<i64: 32, 32>}, {pipeline_mode = #tpu.pipeline_mode<synchronous>, transform_indices = @transform_7, window_bounds = array<i64: 1, 32>}, {pipeline_mode = #tpu.pipeline_mode<synchronous>, transform_indices = @transform_8, window_bounds = array<i64: 72, 16>}, {transform_indices = @transform_9, window_bounds = array<i64: 72, 32>}]} {
    %c0 = arith.constant 0 : index
    %c0_0 = arith.constant 0 : index
    %0 = vector.load %arg1[%c0, %c0_0] : memref<72x64xf32, #tpu.memory_space<vmem>>, vector<72x64xf32>
    %1 = arith.truncf %0 : vector<72x64xf32> to vector<72x64xbf16>
    %c0_1 = arith.constant 0 : index
    %c0_2 = arith.constant 0 : index
    %2 = vector.load %arg2[%c0_1, %c0_2] : memref<16x32xf32, #tpu.memory_space<vmem>>, vector<16x32xf32>
    %3 = arith.truncf %2 : vector<16x32xf32> to vector<16x32xbf16>
    %c0_3 = arith.constant 0 : index
    %c0_4 = arith.constant 0 : index
    %4 = vector.load %arg3[%c0_3, %c0_4] : memref<64x32xbf16, #tpu.memory_space<vmem>>, vector<64x32xbf16>
    %cst = arith.constant dense<0.000000e+00> : vector<72x32xf32>
    %5 = tpu.matmul %1, %4, %cst {dimension_numbers = #tpu.dot_dimension_numbers<[1], [0], [0], [1], [0, 0, 1, 1], [], []>} : vector<72x64xbf16>, vector<64x32xbf16>, vector<72x32xf32> -> vector<72x32xf32>
    %c0_5 = arith.constant 0 : index
    %c0_6 = arith.constant 0 : index
    %6 = vector.load %arg4[%c0_5, %c0_6] : memref<1x32xf32, #tpu.memory_space<vmem>>, vector<1x32xf32>
    %7 = vector.broadcast %6 : vector<1x32xf32> to vector<72x32xf32>
    %8 = arith.addf %5, %7 : vector<72x32xf32>
    %c0_7 = arith.constant 0 : index
    %c0_8 = arith.constant 0 : index
    %9 = vector.load %arg5[%c0_7, %c0_8] : memref<32x32xbf16, #tpu.memory_space<vmem>>, vector<32x32xbf16>
    %cst_9 = arith.constant dense<0.000000e+00> : vector<16x32xf32>
    %10 = tpu.matmul %3, %9, %cst_9 {dimension_numbers = #tpu.dot_dimension_numbers<[1], [0], [0], [1], [0, 0, 1, 1], [], []>} : vector<16x32xbf16>, vector<32x32xbf16>, vector<16x32xf32> -> vector<16x32xf32>
    %c0_10 = arith.constant 0 : index
    %c0_11 = arith.constant 0 : index
    %11 = vector.load %arg6[%c0_10, %c0_11] : memref<1x32xf32, #tpu.memory_space<vmem>>, vector<1x32xf32>
    %12 = vector.broadcast %11 : vector<1x32xf32> to vector<16x32xf32>
    %13 = arith.addf %10, %12 : vector<16x32xf32>
    %c0_12 = arith.constant 0 : index
    %c0_13 = arith.constant 0 : index
    %14 = vector.load %arg7[%c0_12, %c0_13] : memref<32x32xbf16, #tpu.memory_space<vmem>>, vector<32x32xbf16>
    %cst_14 = arith.constant dense<0.000000e+00> : vector<16x32xf32>
    %15 = tpu.matmul %3, %14, %cst_14 {dimension_numbers = #tpu.dot_dimension_numbers<[1], [0], [0], [1], [0, 0, 1, 1], [], []>} : vector<16x32xbf16>, vector<32x32xbf16>, vector<16x32xf32> -> vector<16x32xf32>
    %c0_15 = arith.constant 0 : index
    %c0_16 = arith.constant 0 : index
    %16 = vector.load %arg8[%c0_15, %c0_16] : memref<1x32xf32, #tpu.memory_space<vmem>>, vector<1x32xf32>
    %17 = vector.broadcast %16 : vector<1x32xf32> to vector<16x32xf32>
    %18 = arith.addf %15, %17 : vector<16x32xf32>
    %19 = arith.truncf %8 : vector<72x32xf32> to vector<72x32xbf16>
    %20 = arith.truncf %13 : vector<16x32xf32> to vector<16x32xbf16>
    %cst_17 = arith.constant dense<0.000000e+00> : vector<72x16xf32>
    %21 = tpu.matmul %19, %20, %cst_17 {dimension_numbers = #tpu.dot_dimension_numbers<[1], [1], [0], [0], [0, 0, 1, 0], [], []>} : vector<72x32xbf16>, vector<16x32xbf16>, vector<72x16xf32> -> vector<72x16xf32>
    %c0_18 = arith.constant 0 : index
    %c0_19 = arith.constant 0 : index
    %22 = vector.load %arg9[%c0_18, %c0_19] : memref<72x16xf32, #tpu.memory_space<vmem>>, vector<72x16xf32>
    %23 = arith.addf %21, %22 : vector<72x16xf32>
    %cst_20 = arith.constant dense<0xFF800000> : vector<72xf32>
    %24 = vector.multi_reduction <maximumf>, %23, %cst_20 [1] : vector<72x16xf32> to vector<72xf32>
    %25 = vector.shape_cast %24 : vector<72xf32> to vector<72x1xf32>
    %26 = vector.broadcast %25 : vector<72x1xf32> to vector<72x16xf32>
    %27 = arith.subf %23, %26 : vector<72x16xf32>
    %28 = math.exp %27 : vector<72x16xf32>
    %cst_21 = arith.constant dense<0.000000e+00> : vector<72xf32>
    %29 = vector.multi_reduction <add>, %28, %cst_21 [1] : vector<72x16xf32> to vector<72xf32>
    %30 = vector.shape_cast %29 : vector<72xf32> to vector<72x1xf32>
    %31 = tpu.reciprocal %30 {approx = true} : vector<72x1xf32> -> vector<72x1xf32>
    %32 = vector.broadcast %31 : vector<72x1xf32> to vector<72x16xf32>
    %33 = arith.mulf %28, %32 : vector<72x16xf32>
    %34 = arith.truncf %33 : vector<72x16xf32> to vector<72x16xbf16>
    %35 = arith.truncf %18 : vector<16x32xf32> to vector<16x32xbf16>
    %cst_22 = arith.constant dense<0.000000e+00> : vector<72x32xf32>
    %36 = tpu.matmul %34, %35, %cst_22 {dimension_numbers = #tpu.dot_dimension_numbers<[1], [0], [0], [1], [0, 0, 1, 1], [], []>} : vector<72x16xbf16>, vector<16x32xbf16>, vector<72x32xf32> -> vector<72x32xf32>
    %c0_23 = arith.constant 0 : index
    %c0_24 = arith.constant 0 : index
    %37 = vector.load %arg10[%c0_23, %c0_24] : memref<72x32xf32, #tpu.memory_space<vmem>>, vector<72x32xf32>
    tpu.vector_store %arg10[%c0_23, %c0_24], %36 {strides = array<i32>} : memref<72x32xf32, #tpu.memory_space<vmem>>, vector<72x32xf32>,
    return
  }
  func.func @transform_0(%arg0: i32) -> (i32, i32) {
    %c0_i32 = arith.constant 0 : i32
    %c0_i32_0 = arith.constant 0 : i32
    return %arg0, %c0_i32 : i32, i32
  }
  func.func @transform_1(%arg0: i32) -> (i32, i32) {
    %c0_i32 = arith.constant 0 : i32
    %c0_i32_0 = arith.constant 0 : i32
    return %arg0, %c0_i32 : i32, i32
  }
  func.func @transform_2(%arg0: i32) -> (i32, i32) {
    %c0_i32 = arith.constant 0 : i32
    %c0_i32_0 = arith.constant 0 : i32
    %c0_i32_1 = arith.constant 0 : i32
    return %c0_i32, %c0_i32_0 : i32, i32
  }
  func.func @transform_3(%arg0: i32) -> (i32, i32) {
    %c0_i32 = arith.constant 0 : i32
    %c0_i32_0 = arith.constant 0 : i32
    %c0_i32_1 = arith.constant 0 : i32
    return %c0_i32, %c0_i32_0 : i32, i32
  }
  func.func @transform_4(%arg0: i32) -> (i32, i32) {
    %c0_i32 = arith.constant 0 : i32
    %c0_i32_0 = arith.constant 0 : i32
    %c0_i32_1 = arith.constant 0 : i32
    return %c0_i32, %c0_i32_0 : i32, i32
  }
  func.func @transform_5(%arg0: i32) -> (i32, i32) {
    %c0_i32 = arith.constant 0 : i32
    %c0_i32_0 = arith.constant 0 : i32
    %c0_i32_1 = arith.constant 0 : i32
    return %c0_i32, %c0_i32_0 : i32, i32
  }
  func.func @transform_6(%arg0: i32) -> (i32, i32) {
    %c0_i32 = arith.constant 0 : i32
    %c0_i32_0 = arith.constant 0 : i32
    %c0_i32_1 = arith.constant 0 : i32
    return %c0_i32, %c0_i32_0 : i32, i32
  }
  func.func @transform_7(%arg0: i32) -> (i32, i32) {
    %c0_i32 = arith.constant 0 : i32
    %c0_i32_0 = arith.constant 0 : i32
    %c0_i32_1 = arith.constant 0 : i32
    return %c0_i32, %c0_i32_0 : i32, i32
  }
  func.func @transform_8(%arg0: i32) -> (i32, i32) {
    %c0_i32 = arith.constant 0 : i32
    %c0_i32_0 = arith.constant 0 : i32
    %c0_i32_1 = arith.constant 0 : i32
    return %c0_i32, %c0_i32_0 : i32, i32
  }
  func.func @transform_9(%arg0: i32) -> (i32, i32) {
    %c0_i32 = arith.constant 0 : i32
    %c0_i32_0 = arith.constant 0 : i32
    return %arg0, %c0_i32 : i32, i32
  }
}

</mosaic_0001>

<bundles_post_ra>
// kernel: tpu_custom_call.1
= control target key start
LH: loop header
LB: loop body
LE: loop exit
PB: predicated region body
PF: predicated region fallthrough
CT: control target
= control target key end

     0   :  { %s1280_s30 = smov 0   ;;  %s1468_s0 = inlined_call_operand.vmem [shape: f32[144,64], index: 0, kind: input, shape index: {}]   ;;  %s1469_s1 = inlined_call_operand.vmem [shape: f32[32,32], index: 1, kind: input, shape index: {}]   ;;  %s1470_s2 = inlined_call_operand.vmem [shape: bf16[64,32], index: 2, kind: input, shape index: {}]   ;;  %s1471_s3 = inlined_call_operand.vmem [shape: f32[1,32], index: 3, kind: input, shape index: {}]   ;;  %s1472_s4 = inlined_call_operand.vmem [shape: bf16[32,32], index: 4, kind: input, shape index: {}]   ;;  %s1473_s5 = inlined_call_operand.vmem [shape: f32[1,32], index: 5, kind: input, shape index: {}]   ;;  %s1474_s6 = inlined_call_operand.vmem [shape: bf16[32,32], index: 6, kind: input, shape index: {}]   ;;  %s1475_s7 = inlined_call_operand.vmem [shape: f32[1,32], index: 7, kind: input, shape index: {}]   ;;  %s1476_s8 = inlined_call_operand.vmem [shape: f32[72,16], index: 8, kind: input, shape index: {}]   ;;  %s1477_s9 = inlined_call_operand.vmem [shape: f32[144,32], index: 9, kind: output, shape index: {}]  }
   0x1 LB: > { %s1010_s10 = sadd.s32 4294967295, %s1226_s30   ;;  %p1014_p0 = scmp.ge.s32.totalorder %s1226_s30, 1  ;;  %s1226_s30 = sphi %s1280_s30, %s19_s30  }
   0x2   : > { %p299_p1 = scmp.lt.s32.totalorder %s1226_s30, 3 }
   0x4   : > { %p300_p2 = pnand %p1014_p0, %p299_p1 }
   0x5   : > { %v1176_v0 = vld [vmem:[%s1470_s2] sm:$0xff] (!%p300_p2)   ;;  %v1228_v1 = vmov (!%p300_p2), 0.0   ;;  %v1178_v3 = vld [vmem:[%s1470_s2 + $0x8] sm:$0xff] (!%p300_p2)   ;;  %vm1229_vm0 = vmmov (!%p300_p2), 0   ;;  %s1016_s17 = sshll.u32 (!%p300_p2), %s1010_s10, 1  ;;  %v1180_v5 = vld [vmem:[%s1470_s2 + $0x10] sm:$0xff] (!%p300_p2)  }
   0x6   : > { %303 = sbr.rel (%p300_p2) target bundleno = 1024 (0x400), region = 56  ;;  %1076 = vmatprep.subr.bf16.mxu0 (!%p300_p2), %v1228_v1  ;;  %1104 = vmatprep.subr.bf16.mxu1 (!%p300_p2), %v1228_v1  ;;  %v1177_v2 = vld [vmem:[%s1472_s4] sm:$0xff] (!%p300_p2)   ;;  %v1179_v4 = vld [vmem:[%s1472_s4 + $0x8] sm:$0xff] (!%p300_p2)   ;;  %p347_p3 = scmp.lt.s32.totalorder (!%p300_p2), %s1016_s17, 3  ;;  %vm526_vm1 = vcmask (!%p300_p2), 261120   ;;  %v1181_v10 = vld [vmem:[%s1470_s2 + $0x18] sm:$0xff] (!%p300_p2)  }
   0x7   : > { %1077 = vmatpush3.bf16.msra.mxu0 (!%p300_p2), %v1176_v0  ;;  %1108 = vmatprep.mubr.msk.bf16.mxu1 (!%p300_p2), %vm1229_vm0, %v1228_v1  ;;  %s340_s22 = smul.u32 (!%p300_p2), 9, %s1010_s10  ;;  %v1182_v8 = vld [vmem:[%s1474_s6] sm:$0xff] (!%p300_p2)   ;;  %v1183_v11 = vld [vmem:[%s1474_s6 + $0x8] sm:$0xff] (!%p300_p2)   ;;  %vm415_vm2 = vcmask (!%p300_p2), 523264   ;;  %vm740_vm3 = vcmask (!%p300_p2), 130048  }
   0x8   : > { %1105 = vmatpush3.bf16.msra.mxu1 (!%p300_p2), %v1177_v2  ;;  %1078 = vmatprep.subr.bf16.mxu0 (!%p300_p2), %v1228_v1  ;;  %v1029_v26 = vld [vmem:[%s1473_s5] ss:$0 sm:$0xff] (!%p300_p2) }
   0x9   : > { %1106 = vmatprep.subr.bf16.mxu1 (!%p300_p2), %v1228_v1  ;;  %1084 = vmatprep.mubr.msk.bf16.mxu0 (!%p300_p2), %vm1229_vm0, %v1228_v1  ;;  %p341_p4 = scmp.lt.s32.totalorder (!%p300_p2), %s340_s22, 17  ;;  %v1019_v33 = vld [vmem:[%s1471_s3] ss:$0 sm:$0xff] (!%p300_p2) }
   0xa   : > { %v1033_v38 = vld [vmem:[%s1475_s7] ss:$0 sm:$0xff] (!%p300_p2) }
   0xb   : > { %1079 = vmatpush3.bf16.msra.mxu0 (!%p300_p2), %v1178_v3 }
   0xc   : > { %1107 = vmatpush3.bf16.msra.mxu1 (!%p300_p2), %v1179_v4  ;;  %1080 = vmatprep.subr.bf16.mxu0 (!%p300_p2), %v1228_v1 }
   0xd   : > { %s1479_s17 = smov (!%p347_p3, %s1016_s17), 3  ;;  %1112 = vmatprep.subr.bf16.mxu1 %v1228_v1  ;;  %s1481_s22 = smov (!%p341_p4, %s340_s22), 17 }
   0xe   : > { %s1017_s23 = sshll.u32 %s1479_s17, 3  ;;  %s1015_s11 = sshll.u32 %s1481_s22, 3 }
   0xf   : > { %s350_s26 = scalar_lea.vmem %s1469_s1, %s1017_s23  ;;  %1081 = vmatpush3.bf16.msra.mxu0 %v1180_v5  ;;  %s1332_s14 = scalar_lea.vmem %s1468_s0, %s1015_s11 }
  0x10   : > { %v373_v6 = vld [vmem:[%s350_s26] sm:$0xff]  ;;  %v374_v7 = vld [vmem:[%s350_s26 + $0x8] sm:$0xff]  ;;  %1082 = vmatprep.subr.bf16.mxu0 %v1228_v1  ;;  %v361_v15 = vld [vmem:[%s1332_s14 + $0x10] sm:$0xff]  ;;  %s356_s26 = scalar_lea.vmem %s1477_s9, %s1015_s11 }
  0x11   : > { %v375_v9 = vpack.c.bf16 %v374_v7, %v373_v6  ;;  %v359_v12 = vld [vmem:[%s1332_s14] sm:$0xff]  ;;  %v360_v13 = vld [vmem:[%s1332_s14 + $0x8] sm:$0xff]  ;;  %v362_v16 = vld [vmem:[%s1332_s14 + $0x18] sm:$0xff] }
  0x12   : > { %v368_v14 = vpack.c.bf16 %v360_v13, %v359_v12  ;;  %v369_v17 = vpack.c.bf16 %v362_v16, %v361_v15  ;;  %v363_v18 = vld [vmem:[%s1332_s14 + $0x20] sm:$0xff]  ;;  %v364_v19 = vld [vmem:[%s1332_s14 + $0x28] sm:$0xff]  ;;  %v365_v21 = vld [vmem:[%s1332_s14 + $0x30] sm:$0xff] }
  0x13   : > { %1109 = vmatmul.mubr.msk.bf16.vlgmr.msra.gmra.mrb[0].mxu1 %vm526_vm1, %v375_v9  ;;  %1083 = vmatpush3.bf16.msra.mxu0 %v1181_v10  ;;  %v370_v20 = vpack.c.bf16 %v364_v19, %v363_v18  ;;  %v366_v22 = vld [vmem:[%s1332_s14 + $0x38] sm:$0xff]  ;;  %v367_v24 = vld [vmem:[%s1332_s14 + $0x40] sm:$0xff] }
  0x14   : > { %1113 = vmatpush3.bf16.msra.mxu1 %v1182_v8  ;;  %1116 = vmatprep.mubr.msk.bf16.mxu1 %vm1229_vm0, %v1228_v1  ;;  %v371_v23 = vpack.c.bf16 %v366_v22, %v365_v21  ;;  %v372_v25 = vpack.c.bf16 %v367_v24, %v367_v24  ;;  %v641_v15 = vld [vmem:[%s1476_s8] sm:$0xff]  ;;  %v643_v24 = vld [vmem:[%s1476_s8 + $0x10] sm:$0xff] }
  0x15   : > { %1114 = vmatprep.subr.bf16.mxu1 %v1228_v1  ;;  %1142 = vmatprep.subr.bf16.mxu0 %v1228_v1 }
  0x16   : > { %1085 = vmatmul.mubr.msk.bf16.vlgmr.msra.gmra.mrb[0].mxu0 %vm415_vm2, %v368_v14 }
  0x17   : > { %1088 = vmatprep.mubr.msk.bf16.mxu0 %vm1229_vm0, %v1228_v1 }
  0x18   : > { %1115 = vmatpush3.bf16.msra.mxu1 %v1183_v11 }
  0x19   : > { %1120 = vmatprep.subr.bf16.mxu1 %v1228_v1 }
  0x1b   : > { %1117 = vmatmul.mubr.msk.bf16.vlgmr.msra.gmra.mrb[4].mxu1 %vm526_vm1, %v375_v9 }
  0x1c   : > { %1122 = vmatprep.mubr.msk.bf16.mxu1 %vm1229_vm0, %v1228_v1 }
  0x1e   : > { %1089 = vmatmul.mubr.msk.bf16.gmra.mrb[4].mxu0 %vm415_vm2, %v369_v17  ;;  %v642_v17 = vld [vmem:[%s1476_s8 + $0x8] sm:$0xff] }
  0x1f   : > { %1092 = vmatprep.mubr.msk.bf16.mxu0 %vm1229_vm0, %v1228_v1 }
  0x26   : > { %1093 = vmatmul.mubr.msk.bf16.gmra.mrb[8].mxu0 %vm415_vm2, %v370_v20 }
  0x27   : > { %1096 = vmatprep.mubr.msk.bf16.mxu0 %vm1229_vm0, %v1228_v1 }
  0x2e   : > { %1097 = vmatmul.mubr.msk.bf16.gmra.mrb[12].mxu0 %vm415_vm2, %v371_v23 }
  0x2f   : > { %1100 = vmatprep.mubr.msk.bf16.mxu0 %vm1229_vm0, %v1228_v1 }
  0x36   : > { %1101 = vmatmul.mubr.msk.bf16.gmra.mrb[16].mxu0 %vm415_vm2, %v372_v25 }
  0x37   : > { %1144 = vmatprep.mubr.msk.bf16.mxu0 %vm1229_vm0, %v1228_v1 }
  0xe6   : > { %v564_v27 = vpop.f32.mrb[0].mxu1 }
  0xe7   : > { %v1110_v28 = vpop.f32.mrb[1].mxu1  ;;  %v565_v30 = vadd.f32 %v1029_v26, %v564_v27  ;;  %v644_v27 = vld [vmem:[%s1476_s8 + $0x18] sm:$0xff] }
  0xe8   : > { %v567_v29 = vpop.f32.mrb[2].mxu1 }
  0xe9   : > { %v568_v31 = vadd.f32 %v1029_v26, %v567_v29  ;;  %v1111_v32 = vpop.f32.mrb[3].mxu1  ;;  %v465_v35 = vpop.f32.mrb[0].mxu0 }
  0xea   : > { %v466_v36 = vadd.f32 %v1019_v33, %v465_v35  ;;  %v1086_v37 = vpop.f32.mrb[1].mxu0 }
  0xeb   : > { %v640_v34 = vpack.c.bf16 %v568_v31, %v565_v30  ;;  %v468_v40 = vpop.f32.mrb[2].mxu0 }
  0xec   : > { %v469_v41 = vadd.f32 %v1019_v33, %v468_v40  ;;  %v1087_v42 = vpop.f32.mrb[3].mxu0  ;;  %v645_v40 = vld [vmem:[%s1476_s8 + $0x20] sm:$0xff] }
  0xed   : > { %v666_v39 = vsel %vm526_vm1, %v640_v34, 0  ;;  %v648_v42 = vld [vmem:[%s1476_s8 + $0x38] sm:$0xff] }
  0xee   : > { %1121 = vmatpush3.bf16.xpose.msra.mxu1 %v666_v39  ;;  %v628_v43 = vpop.f32.mrb[4].mxu1  ;;  %v635_v46 = vpack.c.bf16 %v469_v41, %v466_v36  ;;  %v647_v39 = vld [vmem:[%s1476_s8 + $0x30] sm:$0xff] }
  0xef   : > { %v629_v44 = vadd.f32 %v1033_v38, %v628_v43  ;;  %v1118_v45 = vpop.f32.mrb[5].mxu1  ;;  %1164 = vmatprep.subr.bf16.mxu1 %v1228_v1 }
  0xf0   : > { %v631_v47 = vpop.f32.mrb[6].mxu1  ;;  %v646_v45 = vld [vmem:[%s1476_s8 + $0x28] sm:$0xff] }
  0xf1   : > { %v632_v48 = vadd.f32 %v1033_v38, %v631_v47  ;;  %v1119_v49 = vpop.f32.mrb[7].mxu1  ;;  %v473_v50 = vpop.f32.mrb[4].mxu0 }
  0xf2   : > { %v474_v52 = vadd.f32 %v1019_v33, %v473_v50  ;;  %v1090_v53 = vpop.f32.mrb[5].mxu0 }
  0xf3   : > { %v845_v51 = vpack.c.bf16 %v632_v48, %v629_v44  ;;  %v476_v54 = vpop.f32.mrb[6].mxu0  ;;  %v649_v53 = vld [vmem:[%s1476_s8 + $0x40] sm:$0xff] }
  0xf4   : > { %v477_v55 = vadd.f32 %v1019_v33, %v476_v54  ;;  %v1091_v56 = vpop.f32.mrb[7].mxu0 }
  0xf5   : > { %1123 = vmatmul.mubr.msk.bf16.vlgmr.msra.gmra.mrb[8].mxu1 %vm526_vm1, %v635_v46  ;;  %1143 = vmatpush3.bf16.msra.mxu0 %v845_v51 }
  0xf6   : > { %1126 = vmatprep.mubr.msk.bf16.mxu1 %vm1229_vm0, %v1228_v1  ;;  %1165 = vmatpush3.bf16.msra.mxu1 %v845_v51  ;;  %v636_v57 = vpack.c.bf16 %v477_v55, %v474_v52 }
  0xf9   : > { %v481_v58 = vpop.f32.mrb[8].mxu0 }
  0xfa   : > { %v482_v59 = vadd.f32 %v1019_v33, %v481_v58  ;;  %v1094_v60 = vpop.f32.mrb[9].mxu0 }
  0xfb   : > { %v484_v61 = vpop.f32.mrb[10].mxu0 }
  0xfc   : > { %v485_v62 = vadd.f32 %v1019_v33, %v484_v61  ;;  %v1095_v63 = vpop.f32.mrb[11].mxu0 }
  0xfd   : > { %1127 = vmatmul.mubr.msk.bf16.gmra.mrb[12].mxu1 %vm526_vm1, %v636_v57 }
  0xfe   : > { %1130 = vmatprep.mubr.msk.bf16.mxu1 %vm1229_vm0, %v1228_v1  ;;  %v637_v0 = vpack.c.bf16 %v485_v62, %v482_v59 }
 0x101   : > { %v489_v2 = vpop.f32.mrb[12].mxu0 }
 0x102   : > { %v490_v3 = vadd.f32 %v1019_v33, %v489_v2  ;;  %v1098_v4 = vpop.f32.mrb[13].mxu0 }
 0x103   : > { %v492_v5 = vpop.f32.mrb[14].mxu0 }
 0x104   : > { %v493_v6 = vadd.f32 %v1019_v33, %v492_v5  ;;  %v1099_v7 = vpop.f32.mrb[15].mxu0 }
 0x105   : > { %1131 = vmatmul.mubr.msk.bf16.gmra.mrb[16].mxu1 %vm526_vm1, %v637_v0 }
 0x106   : > { %1134 = vmatprep.mubr.msk.bf16.mxu1 %vm1229_vm0, %v1228_v1  ;;  %v638_v8 = vpack.c.bf16 %v493_v6, %v490_v3 }
 0x109   : > { %v497_v9 = vpop.f32.mrb[16].mxu0 }
 0x10a   : > { %v1102_v10 = vpop.f32.mrb[17].mxu0  ;;  %v498_v11 = vadd.f32 %v1019_v33, %v497_v9 }
 0x10b   : > { %v500_v12 = vpop.f32.mrb[18].mxu0 }
 0x10c   : > { %v1103_v13 = vpop.f32.mrb[19].mxu0  ;;  %v639_v14 = vpack.c.bf16 %v498_v11, %v498_v11 }
 0x10d   : > { %1135 = vmatmul.mubr.msk.bf16.gmra.mrb[20].mxu1 %vm526_vm1, %v638_v8 }
 0x10e   : > { %1138 = vmatprep.mubr.msk.bf16.mxu1 %vm1229_vm0, %v1228_v1 }
 0x115   : > { %1139 = vmatmul.mubr.msk.bf16.gmra.mrb[24].mxu1 %vm526_vm1, %v639_v14 }
 0x116   : > { %1156 = vmatprep.mubr.msk.bf16.mxu1 %vm1229_vm0, %v1228_v1 }
 0x1c8   : > { %v702_v16 = vpop.f32.mrb[8].mxu1 }
 0x1c9   : > { %v703_v18 = vadd.f32 %v702_v16, %v641_v15  ;;  %v1124_v19 = vpop.f32.mrb[9].mxu1 }
 0x1ca   : > { %v705_v20 = vpop.f32.mrb[10].mxu1 }
 0x1cb   : > { %v706_v21 = vadd.f32 %v705_v20, %v642_v17  ;;  %v1125_v22 = vpop.f32.mrb[11].mxu1  ;;  %v741_v23 = vsel %vm740_vm3, %v703_v18, -inf }
 0x1cc   : > { %742 = vmax.xlane.f32.xlu0 %v741_v23 }
 0x1cd   : > { %v744_v25 = vsel %vm740_vm3, %v706_v21, -inf }
 0x1d0   : > { %745 = vmax.xlane.f32.xlu0 %v744_v25  ;;  %v710_v26 = vpop.f32.mrb[12].mxu1 }
 0x1d1   : > { %v711_v28 = vadd.f32 %v710_v26, %v643_v24  ;;  %v1128_v29 = vpop.f32.mrb[13].mxu1 }
 0x1d2   : > { %v713_v30 = vpop.f32.mrb[14].mxu1 }
 0x1d3   : > { %v714_v31 = vadd.f32 %v713_v30, %v644_v27  ;;  %v1129_v32 = vpop.f32.mrb[15].mxu1  ;;  %v747_v33 = vsel %vm740_vm3, %v711_v28, -inf }
 0x1d4   : > { %748 = vmax.xlane.f32.xlu1 %v747_v33 }
 0x1d5   : > { %v750_v34 = vsel %vm740_vm3, %v714_v31, -inf }
 0x1d8   : > { %751 = vmax.xlane.f32.xlu1 %v750_v34  ;;  %v718_v35 = vpop.f32.mrb[16].mxu1 }
 0x1d9   : > { %v1132_v36 = vpop.f32.mrb[17].mxu1  ;;  %v719_v47 = vadd.f32 %v718_v35, %v645_v40 }
 0x1da   : > { %v721_v37 = vpop.f32.mrb[18].mxu1 }
 0x1db   : > { %v1133_v38 = vpop.f32.mrb[19].mxu1  ;;  %v722_v51 = vadd.f32 %v721_v37, %v646_v45  ;;  %v753_v54 = vsel %vm740_vm3, %v719_v47, -inf }
 0x1dd   : > { %v756_v58 = vsel %vm740_vm3, %v722_v51, -inf }
 0x1e0   : > { %v726_v41 = vpop.f32.mrb[20].mxu1 }
 0x1e1   : > { %v727_v43 = vadd.f32 %v726_v41, %v647_v39  ;;  %v1136_v44 = vpop.f32.mrb[21].mxu1 }
 0x1e2   : > { %v729_v46 = vpop.f32.mrb[22].mxu1 }
 0x1e3   : > { %v730_v48 = vadd.f32 %v729_v46, %v648_v42  ;;  %v1137_v49 = vpop.f32.mrb[23].mxu1  ;;  %v759_v50 = vsel %vm740_vm3, %v727_v43, -inf }
 0x1e4   : > { %760 = vmax.xlane.f32.xlu0 %v759_v50 }
 0x1e5   : > { %v762_v52 = vsel %vm740_vm3, %v730_v48, -inf }
 0x1e6   : > { %763 = vmax.xlane.f32.xlu1 %v762_v52 }
 0x1e8   : > { %754 = vmax.xlane.f32.xlu0 %v753_v54  ;;  %v734_v55 = vpop.f32.mrb[24].mxu1 }
 0x1e9   : > { %v735_v56 = vadd.f32 %v734_v55, %v649_v53  ;;  %v1140_v57 = vpop.f32.mrb[25].mxu1 }
 0x1ea   : > { %757 = vmax.xlane.f32.xlu1 %v756_v58  ;;  %v737_v59 = vpop.f32.mrb[26].mxu1 }
 0x1eb   : > { %v1141_v60 = vpop.f32.mrb[27].mxu1  ;;  %v765_v61 = vsel %vm740_vm3, %v735_v56, -inf }
 0x1ec   : > { %766 = vmax.xlane.f32.xlu0 %v765_v61 }
 0x259   : > { %v743_v62 = vpop.xlane.xlu0 %742 }
 0x25a   : > { %v768_v63 = vsub.f32 %v703_v18, %v743_v62 }
 0x25c   : > { %v777_v0 = vmul.f32 1.442695, %v768_v63 }
 0x25d   : > { %v746_v2 = vpop.xlane.xlu0 %745 }
 0x25e   : > { %1184 = vpow2.f32 %v777_v0  ;;  %v769_v3 = vsub.f32 %v706_v21, %v746_v2 }
 0x260   : > { %v779_v4 = vmul.f32 1.442695, %v769_v3 }
 0x261   : > { %v749_v5 = vpop.xlane.xlu1 %748 }
 0x262   : > { %1186 = vpow2.f32 %v779_v4  ;;  %v770_v6 = vsub.f32 %v711_v28, %v749_v5 }
 0x264   : > { %v781_v7 = vmul.f32 1.442695, %v770_v6 }
 0x265   : > { %v752_v8 = vpop.xlane.xlu1 %751 }
 0x266   : > { %1188 = vpow2.f32 %v781_v7  ;;  %v771_v9 = vsub.f32 %v714_v31, %v752_v8 }
 0x268   : > { %v1185_v10 = vpop.eup %1184  ;;  %v783_v11 = vmul.f32 1.442695, %v771_v9 }
 0x269   : > { %v795_v12 = vsel %vm740_vm3, %v1185_v10, 0.0 }
 0x26a   : > { %1190 = vpow2.f32 %v783_v11  ;;  %796 = vadd.xlane.f32.xlu1 %v795_v12 }
 0x26c   : > { %v1187_v13 = vpop.eup %1186 }
 0x26d   : > { %v798_v14 = vsel %vm740_vm3, %v1187_v13, 0.0 }
 0x26e   : > { %799 = vadd.xlane.f32.xlu0 %v798_v14 }
 0x270   : > { %v1189_v15 = vpop.eup %1188 }
 0x271   : > { %v761_v16 = vpop.xlane.xlu0 %760  ;;  %v801_v17 = vsel %vm740_vm3, %v1189_v15, 0.0 }
 0x272   : > { %v774_v18 = vsub.f32 %v727_v43, %v761_v16  ;;  %802 = vadd.xlane.f32.xlu1 %v801_v17 }
 0x273   : > { %v764_v19 = vpop.xlane.xlu1 %763 }
 0x274   : > { %v1191_v20 = vpop.eup %1190  ;;  %v789_v21 = vmul.f32 1.442695, %v774_v18  ;;  %v775_v22 = vsub.f32 %v730_v48, %v764_v19 }
 0x275   : > { %v755_v23 = vpop.xlane.xlu0 %754  ;;  %v804_v24 = vsel %vm740_vm3, %v1191_v20, 0.0 }
 0x276   : > { %1192 = vpow2.f32 %v789_v21  ;;  %v791_v25 = vmul.f32 1.442695, %v775_v22  ;;  %v772_v26 = vsub.f32 %v719_v47, %v755_v23  ;;  %805 = vadd.xlane.f32.xlu0 %v804_v24 }
 0x277   : > { %v758_v27 = vpop.xlane.xlu1 %757 }
 0x278   : > { %1194 = vpow2.f32 %v791_v25  ;;  %v785_v28 = vmul.f32 1.442695, %v772_v26  ;;  %v773_v29 = vsub.f32 %v722_v51, %v758_v27 }
 0x279   : > { %v767_v30 = vpop.xlane.xlu0 %766 }
 0x27a   : > { %1196 = vpow2.f32 %v785_v28  ;;  %v787_v31 = vmul.f32 1.442695, %v773_v29  ;;  %v776_v32 = vsub.f32 %v735_v56, %v767_v30 }
 0x27c   : > { %1198 = vpow2.f32 %v787_v31  ;;  %v793_v33 = vmul.f32 1.442695, %v776_v32 }
 0x27e   : > { %1200 = vpow2.f32 %v793_v33 }
 0x280   : > { %v1193_v34 = vpop.eup %1192 }
 0x281   : > { %v813_v35 = vsel %vm740_vm3, %v1193_v34, 0.0 }
 0x282   : > { %v1195_v36 = vpop.eup %1194  ;;  %814 = vadd.xlane.f32.xlu1 %v813_v35 }
 0x283   : > { %v816_v37 = vsel %vm740_vm3, %v1195_v36, 0.0 }
 0x284   : > { %v1197_v38 = vpop.eup %1196  ;;  %817 = vadd.xlane.f32.xlu0 %v816_v37 }
 0x285   : > { %v807_v39 = vsel %vm740_vm3, %v1197_v38, 0.0 }
 0x286   : > { %v1199_v40 = vpop.eup %1198  ;;  %808 = vadd.xlane.f32.xlu1 %v807_v39 }
 0x287   : > { %v810_v41 = vsel %vm740_vm3, %v1199_v40, 0.0 }
 0x288   : > { %v1201_v42 = vpop.eup %1200  ;;  %811 = vadd.xlane.f32.xlu0 %v810_v41 }
 0x289   : > { %v819_v43 = vsel %vm740_vm3, %v1201_v42, 0.0 }
 0x28a   : > { %820 = vadd.xlane.f32.xlu1 %v819_v43 }
 0x2f7   : > { %v797_v44 = vpop.xlane.xlu1 %796 }
 0x2f8   : > { %1202 = vrcp.f32 %v797_v44 }
 0x2fb   : > { %v800_v45 = vpop.xlane.xlu0 %799 }
 0x2fc   : > { %1204 = vrcp.f32 %v800_v45 }
 0x2ff   : > { %v803_v46 = vpop.xlane.xlu1 %802 }
 0x300   : > { %1206 = vrcp.f32 %v803_v46 }
 0x302   : > { %v1203_v48 = vpop.eup %1202 }
 0x303   : > { %v806_v47 = vpop.xlane.xlu0 %805  ;;  %v831_v50 = vmul.f32 %v1203_v48, %v1185_v10 }
 0x304   : > { %1208 = vrcp.f32 %v806_v47 }
 0x306   : > { %v1205_v49 = vpop.eup %1204 }
 0x307   : > { %v832_v51 = vmul.f32 %v1205_v49, %v1187_v13 }
 0x309   : > { %v840_v52 = vpack.c.bf16 %v832_v51, %v831_v50 }
 0x30a   : > { %v1207_v53 = vpop.eup %1206 }
 0x30b   : > { %1145 = vmatmul.mubr.msk.bf16.vlgmr.msra.gmra.mrb[20].mxu0 %vm740_vm3, %v840_v52  ;;  %v833_v56 = vmul.f32 %v1207_v53, %v1189_v15 }
 0x30c   : > { %1148 = vmatprep.mubr.msk.bf16.mxu0 %vm1229_vm0, %v1228_v1 }
 0x30e   : > { %v1209_v54 = vpop.eup %1208 }
 0x30f   : > { %v815_v55 = vpop.xlane.xlu1 %814  ;;  %v834_v57 = vmul.f32 %v1209_v54, %v1191_v20 }
 0x310   : > { %1210 = vrcp.f32 %v815_v55 }
 0x311   : > { %v818_v58 = vpop.xlane.xlu0 %817  ;;  %v841_v59 = vpack.c.bf16 %v834_v57, %v833_v56 }
 0x312   : > { %1212 = vrcp.f32 %v818_v58 }
 0x313   : > { %v809_v60 = vpop.xlane.xlu1 %808  ;;  %1149 = vmatmul.mubr.msk.bf16.gmra.mrb[24].mxu0 %vm740_vm3, %v841_v59 }
 0x314   : > { %1214 = vrcp.f32 %v809_v60  ;;  %1152 = vmatprep.mubr.msk.bf16.mxu0 %vm1229_vm0, %v1228_v1 }
 0x315   : > { %v812_v61 = vpop.xlane.xlu0 %811 }
 0x316   : > { %1216 = vrcp.f32 %v812_v61 }
 0x317   : > { %v821_v62 = vpop.xlane.xlu1 %820 }
 0x318   : > { %1218 = vrcp.f32 %v821_v62 }
 0x31a   : > { %v1211_v63 = vpop.eup %1210 }
 0x31b   : > { %v837_v2 = vmul.f32 %v1211_v63, %v1193_v34 }
 0x31c   : > { %v1213_v0 = vpop.eup %1212 }
 0x31d   : > { %v838_v3 = vmul.f32 %v1213_v0, %v1195_v36 }
 0x31e   : > { %v1215_v4 = vpop.eup %1214 }
 0x31f   : > { %v843_v5 = vpack.c.bf16 %v838_v3, %v837_v2  ;;  %v835_v7 = vmul.f32 %v1215_v4, %v1197_v38 }
 0x320   : > { %v1217_v6 = vpop.eup %1216 }
 0x321   : > { %1157 = vmatmul.mubr.msk.bf16.vlgmr.msra.gmra.mrb[28].mxu1 %vm740_vm3, %v843_v5  ;;  %v836_v8 = vmul.f32 %v1217_v6, %v1199_v40 }
 0x322   : > { %v1219_v9 = vpop.eup %1218  ;;  %1160 = vmatprep.mubr.msk.bf16.mxu1 %vm1229_vm0, %v1228_v1 }
 0x323   : > { %v842_v10 = vpack.c.bf16 %v836_v8, %v835_v7  ;;  %v839_v11 = vmul.f32 %v1219_v9, %v1201_v42 }
 0x325   : > { %1153 = vmatmul.mubr.msk.bf16.gmra.mrb[28].mxu0 %vm740_vm3, %v842_v10  ;;  %v844_v12 = vpack.c.bf16 %v839_v11, %v839_v11 }
 0x329   : > { %1161 = vmatmul.mubr.msk.bf16.gmra.mrb[32].mxu1 %vm740_vm3, %v844_v12 }
 0x3de   : > { %v895_v13 = vpop.f32.mrb[20].mxu0 }
 0x3df   : > { %933 = vst.msk [vmem:[%s356_s26] sm:$0xff] %vm526_vm1, %v895_v13  ;;  %v1146_v14 = vpop.f32.mrb[21].mxu0 }
 0x3e0   : > { %v898_v15 = vpop.f32.mrb[22].mxu0 }
 0x3e1   : > { %934 = vst.msk [vmem:[%s356_s26 + $0x8] sm:$0xff] %vm526_vm1, %v898_v15  ;;  %v1147_v1 = vpop.f32.mrb[23].mxu0 }
 0x3e6   : > { %v903_v16 = vpop.f32.mrb[24].mxu0 }
 0x3e7   : > { %935 = vst.msk [vmem:[%s356_s26 + $0x10] sm:$0xff] %vm526_vm1, %v903_v16  ;;  %v1150_v17 = vpop.f32.mrb[25].mxu0 }
 0x3e8   : > { %v906_v18 = vpop.f32.mrb[26].mxu0 }
 0x3e9   : > { %936 = vst.msk [vmem:[%s356_s26 + $0x18] sm:$0xff] %vm526_vm1, %v906_v18  ;;  %v1151_v19 = vpop.f32.mrb[27].mxu0 }
 0x3f4   : > { %v919_v20 = vpop.f32.mrb[28].mxu1 }
 0x3f5   : > { %939 = vst.msk [vmem:[%s356_s26 + $0x30] sm:$0xff] %vm526_vm1, %v919_v20  ;;  %v1158_v21 = vpop.f32.mrb[29].mxu1 }
 0x3f6   : > { %v922_v22 = vpop.f32.mrb[30].mxu1 }
 0x3f7   : > { %940 = vst.msk [vmem:[%s356_s26 + $0x38] sm:$0xff] %vm526_vm1, %v922_v22  ;;  %v1159_v23 = vpop.f32.mrb[31].mxu1 }
 0x3f8   : > { %v911_v24 = vpop.f32.mrb[28].mxu0 }
 0x3f9   : > { %937 = vst.msk [vmem:[%s356_s26 + $0x20] sm:$0xff] %vm526_vm1, %v911_v24  ;;  %v1154_v25 = vpop.f32.mrb[29].mxu0 }
 0x3fa   : > { %v914_v26 = vpop.f32.mrb[30].mxu0 }
 0x3fb   : > { %938 = vst.msk [vmem:[%s356_s26 + $0x28] sm:$0xff] %vm526_vm1, %v914_v26  ;;  %v1155_v27 = vpop.f32.mrb[31].mxu0 }
 0x3fc   : > { %v927_v28 = vpop.f32.mrb[32].mxu1 }
 0x3fd   : > { %941 = vst.msk [vmem:[%s356_s26 + $0x40] sm:$0xff] %vm526_vm1, %v927_v28  ;;  %v1162_v29 = vpop.f32.mrb[33].mxu1 }
 0x3fe   : > { %v930_v30 = vpop.f32.mrb[34].mxu1 }
 0x3ff   : > { %v1163_v31 = vpop.f32.mrb[35].mxu1 }
 0x400 PF: > { %s19_s30 = sadd.s32 1, %s1226_s30  }
 0x401   : > { %p16_p5 = scmp.ge.s32.totalorder %s19_s30, 4  }
 0x403   :  { %18 = sbr.rel (!%p16_p5) target bundleno = 1 (0x1), region = 89 }

</bundles_post_ra>
